<compile_context>
chip_gen: v7x
topology: tpu7x:2x2x1
jax: 0.10.0
libtpu: 0.0.40
codegen_flags: <defaults>
</compile_context>

<pallas_src>
import functools

import jax
import jax.numpy as jnp
from jax.experimental import pallas as pl
from jax.experimental.pallas import tpu as pltpu


def _psa_s_kernel(x_ref, wqr_ref, wvr_ref, wup1_ref, bup1_ref, lnw_ref, lnb_ref,
                  wup2_ref, bup2_ref, wql_ref, wvl_ref, o_ref, *, bt, hw, hwp):
    f32 = jnp.float32
    need_mask = hw != hwp                       # static Python bool
    inv_hw = 1.0 / float(hw)

    # Small weight/bias tiles: load once, reuse for every packed batch element.
    wqr = wqr_ref[...]                          # (1, C)
    wvr = wvr_ref[...]                          # (Cp, C)
    wup1 = wup1_ref[...]                        # (Cr, Cp)
    bup1 = bup1_ref[...]                        # (Cr, 1)
    lnw = lnw_ref[...]                          # (Cr, 1)
    lnb = lnb_ref[...]                          # (Cr, 1)
    wup2 = wup2_ref[...]                        # (C, Cr)
    bup2 = bup2_ref[...]                        # (C, 1)
    wql = wql_ref[...]                          # (Cp, C)
    wvl = wvl_ref[...]                          # (Cp, C)

    # Hoisted constants (never rebuilt inside the batch loop).
    row_sel = jax.lax.broadcasted_iota(jnp.int32, (2, hwp), 0)
    if need_mask:
        valid = jax.lax.broadcasted_iota(jnp.int32, (1, hwp), 1) < hw

    for bi in range(bt):                        # static unroll over packed batch elements
        x = x_ref[bi]                           # (C, HWp), native dtype

        # ---------------- spatial_pool ----------------
        q_r = jnp.dot(wqr.astype(x.dtype), x, preferred_element_type=f32)        # (1, HWp)
        if need_mask:
            q_r = jnp.where(valid, q_r, -jnp.inf)
        q_r = q_r - jnp.max(q_r, axis=1, keepdims=True)
        e_r = jnp.exp(q_r)                                                        # (1, HWp)
        inv_den = pl.reciprocal(jnp.sum(e_r, axis=1, keepdims=True), approx=False)  # (1, 1)

        # One (C,HWp) x (2,HWp)^T MXU contraction: col 0 -> x . e_r^T, col 1 -> mean_HW(x).
        rhs = jnp.where(row_sel == 0, jnp.broadcast_to(e_r, (2, hwp)), inv_hw)    # (2, HWp) f32
        pe = jax.lax.dot_general(x, rhs.astype(x.dtype), (((1,), (1,)), ((), ())),
                                 preferred_element_type=f32)                      # (C, 2)
        x_e = pe[:, 0:1]                                                          # (C, 1)
        x_mean = pe[:, 1:2]                                                       # (C, 1)

        context = jnp.dot(wvr, x_e, preferred_element_type=f32) * inv_den         # (Cp, 1)

        # conv_up: Conv1x1(+bias) -> LayerNorm(over Cr) -> ReLU -> Conv1x1(+bias) -> sigmoid
        z1 = jnp.dot(wup1, context, preferred_element_type=f32) + bup1            # (Cr, 1)
        mu = jnp.mean(z1, axis=0, keepdims=True)
        var = jnp.mean(jnp.square(z1 - mu), axis=0, keepdims=True)
        z1 = (z1 - mu) * jax.lax.rsqrt(var + 1e-5)
        z1 = jnp.maximum(z1 * lnw + lnb, 0.0)
        z2 = jnp.dot(wup2, z1, preferred_element_type=f32) + bup2                 # (C, 1)
        mask_ch = jax.nn.sigmoid(z2)                                              # (C, 1) f32

        # ---------------- channel_pool (y = x * mask_ch is never materialized) ----------------
        # avg_pool(conv_q_left(y)) == w_q_left @ (mask_ch * mean_HW(x))   (two linear folds)
        avg = jnp.dot(wql, mask_ch * x_mean, preferred_element_type=f32)          # (Cp, 1)

        # conv_v_left(y) == (w_v_left * mask_ch^T) @ x  -> scale the tiny weight, not the slab.
        wvl_s = wvl * jnp.transpose(mask_ch)                                      # (Cp, C)
        theta = jnp.dot(wvl_s.astype(x.dtype), x, preferred_element_type=f32)     # (Cp, HWp)
        if need_mask:
            theta = jnp.where(valid, theta, -jnp.inf)
        theta = theta - jnp.max(theta, axis=1, keepdims=True)
        e_l = jnp.exp(theta)                                                      # (Cp, HWp)
        scale = avg * pl.reciprocal(jnp.sum(e_l, axis=1, keepdims=True),
                                    approx=False)                                 # (Cp, 1)
        # ctx = avg^T @ softmax_HW(theta), with the softmax denominator folded into `scale`
        # and the Cp contraction done on the MXU (no normalized map is stored).
        ctx = jax.lax.dot_general(scale, e_l, (((0,), (0,)), ((), ())),
                                  preferred_element_type=f32)                     # (1, HWp)
        mask_sp = jax.nn.sigmoid(ctx)                                             # (1, HWp)

        # out = y * mask_sp = x * mask_ch * mask_sp, fused in one pass over the slab.
        # (mask casts to x.dtype are exact for f32 inputs; slight bf16 divergence is documented.)
        o_ref[bi] = (x * mask_ch.astype(x.dtype) * mask_sp.astype(x.dtype)).astype(o_ref.dtype)


def psa_s_forward(x_nchw, w_q_right, w_v_right, w_up1, b_up1, ln_w, ln_b,
                  w_up2, b_up2, w_q_left, w_v_left):
    """PSA_s forward. x_nchw: (B, C, H, W). 1x1 conv weights as (Cout, Cin)."""
    B, C, H, W = x_nchw.shape
    HW = H * W
    Cp = w_v_right.shape[0]
    P = w_up2.shape[0]
    assert P == C, "planes must equal inplanes for the x * mask_ch broadcast"

    # (B, C, H, W) -> (B, C, HW): pure reshape; pad HW to a 128-lane multiple (zero padding;
    # padded lanes are masked to -inf before both softmaxes inside the kernel).
    HWp = ((HW + 127) // 128) * 128
    x = x_nchw.reshape(B, C, HW)
    if HWp != HW:
        x = jnp.pad(x, ((0, 0), (0, 0), (0, HWp - HW)))

    f32 = jnp.float32
    col = lambda v: v.reshape(-1, 1).astype(f32)
    operands = (x,
                w_q_right.astype(f32), w_v_right.astype(f32),
                w_up1.astype(f32), col(b_up1), col(ln_w), col(ln_b),
                w_up2.astype(f32), col(b_up2),
                w_q_left.astype(f32), w_v_left.astype(f32))

    # Pack several batch elements per grid step when the per-element slab is small, so each
    # grid step / DMA carries a useful payload (per-step overhead ~0.35us).
    itemsize = x.dtype.itemsize
    per_elem_bytes = C * HWp * itemsize
    BT = 1
    if per_elem_bytes < (1 << 20):
        want = int(max(1, min(B, (1 << 20) // max(per_elem_bytes, 1))))
        for bt in range(want, 0, -1):
            if B % bt == 0:
                BT = bt
                break

    def full_spec(a):
        return pl.BlockSpec(a.shape, lambda b, _n=a.ndim: (0,) * _n)

    in_specs = [pl.BlockSpec((BT, C, HWp), lambda b: (b, 0, 0))]
    in_specs += [full_spec(a) for a in operands[1:]]

    # VMEM budget: double-buffered x/out blocks + live f32 temporaries + double-buffered weights,
    # capped at 75% of physical VMEM (leave headroom for Mosaic scratch; v7x has only 64 MiB).
    try:
        phys_vmem = int(getattr(pltpu.get_tpu_info(), "vmem_capacity_bytes", 128 * 2 ** 20))
    except Exception:
        phys_vmem = 128 * 2 ** 20
    cap = (phys_vmem * 3) // 4
    weight_bytes = sum(int(a.size) * a.dtype.itemsize for a in operands[1:])
    est = (4 * BT * C * HWp * itemsize          # double-buffered input + output blocks
           + BT * (Cp + 8) * HWp * 4            # live f32 temporaries (theta/e_l, e_r, ctx, ...)
           + 2 * weight_bytes                   # weights are double-buffered too
           + (4 << 20))                         # Mosaic internal scratch slack
    vmem_limit = int(min(cap, max(32 * 2 ** 20, est)))

    out = pl.pallas_call(
        functools.partial(_psa_s_kernel, bt=BT, hw=HW, hwp=HWp),
        out_shape=jax.ShapeDtypeStruct((B, C, HWp), x.dtype),
        grid_spec=pltpu.PrefetchScalarGridSpec(
            num_scalar_prefetch=0,
            grid=(B // BT,),
            in_specs=in_specs,
            out_specs=pl.BlockSpec((BT, C, HWp), lambda b: (b, 0, 0)),
        ),
        compiler_params=pltpu.CompilerParams(
            dimension_semantics=("parallel",),
            vmem_limit_bytes=vmem_limit),
    )(*operands)

    if HWp != HW:
        out = out[:, :, :HW]
    return out.reshape(B, C, H, W)


def _reference(x, w_q_right, w_v_right, w_up1, b_up1, ln_w, ln_b,
               w_up2, b_up2, w_q_left, w_v_left):
    """Pure-jnp mirror of the PyTorch PSA_s forward (sequential variant)."""
    B, C, H, W = x.shape
    HW = H * W
    conv1x1 = lambda t, w: jnp.einsum('bchw,oc->bohw', t, w)

    # spatial_pool
    input_x = conv1x1(x, w_v_right).reshape(B, -1, HW)                # (B, Cp, HW)
    mask = conv1x1(x, w_q_right).reshape(B, 1, HW)                    # (B, 1, HW)
    mask = jax.nn.softmax(mask, axis=2)
    context = jnp.einsum('bch,bqh->bc', input_x, mask)                # (B, Cp)
    z1 = jnp.einsum('bc,oc->bo', context, w_up1) + b_up1              # (B, Cr)
    mu = jnp.mean(z1, axis=1, keepdims=True)
    var = jnp.mean((z1 - mu) ** 2, axis=1, keepdims=True)
    z1 = (z1 - mu) / jnp.sqrt(var + 1e-5) * ln_w + ln_b
    z1 = jnp.maximum(z1, 0.0)
    z2 = jnp.einsum('bc,oc->bo', z1, w_up2) + b_up2                   # (B, C)
    mask_ch = jax.nn.sigmoid(z2)[:, :, None, None]
    y = x * mask_ch

    # channel_pool (on y)
    g = conv1x1(y, w_q_left)                                          # (B, Cp, H, W)
    avg = jnp.mean(g, axis=(2, 3))                                    # (B, Cp)
    theta = conv1x1(y, w_v_left).reshape(B, -1, HW)                   # (B, Cp, HW)
    theta = jax.nn.softmax(theta, axis=2)
    ctx = jnp.einsum('bc,bch->bh', avg, theta)                        # (B, HW)
    mask_sp = jax.nn.sigmoid(ctx).reshape(B, 1, H, W)
    return y * mask_sp


if __name__ == "__main__":
    key = jax.random.PRNGKey(0)
    # inplanes = planes = 16 so inter_planes = 8 and inter_planes // 4 = 2 (> 0).
    B, C, H, W = 2, 16, 16, 16
    Cp = C // 2            # inter_planes
    Cr = Cp // 4           # conv_up hidden width

    keys = jax.random.split(key, 12)
    x = jax.random.normal(keys[0], (B, C, H, W), dtype=jnp.float32)

    # kaiming_normal_(mode='fan_in', nonlinearity='relu') for the bias-free 1x1 convs
    def kaiming(k, cout, cin):
        return jax.random.normal(k, (cout, cin), dtype=jnp.float32) * jnp.sqrt(2.0 / cin)

    w_q_right = kaiming(keys[1], 1, C)        # conv_q_right: C -> 1
    w_v_right = kaiming(keys[2], Cp, C)       # conv_v_right: C -> Cp
    w_q_left  = kaiming(keys[3], Cp, C)       # conv_q_left:  C -> Cp
    w_v_left  = kaiming(keys[4], Cp, C)       # conv_v_left:  C -> Cp

    # conv_up parameters (Conv+bias, LayerNorm affine, Conv+bias)
    w_up1 = jax.random.normal(keys[5], (Cr, Cp), dtype=jnp.float32) * 0.3
    b_up1 = jax.random.normal(keys[6], (Cr,), dtype=jnp.float32) * 0.1
    ln_w  = 1.0 + 0.1 * jax.random.normal(keys[7], (Cr,), dtype=jnp.float32)
    ln_b  = 0.1 * jax.random.normal(keys[8], (Cr,), dtype=jnp.float32)
    w_up2 = jax.random.normal(keys[9], (C, Cr), dtype=jnp.float32) * 0.3
    b_up2 = jax.random.normal(keys[10], (C,), dtype=jnp.float32) * 0.1

    out = psa_s_forward(x, w_q_right, w_v_right, w_up1, b_up1, ln_w, ln_b,
                        w_up2, b_up2, w_q_left, w_v_left)
    out = jax.block_until_ready(out)

    ref = _reference(x, w_q_right, w_v_right, w_up1, b_up1, ln_w, ln_b,
                     w_up2, b_up2, w_q_left, w_v_left)
    assert out.shape == (B, C, H, W)
    assert jnp.allclose(out, ref, atol=1e-4, rtol=1e-4), "mismatch vs reference"

    print("KERNEL_OK")
</pallas_src>

<mosaic_0001>
module attributes {stable_mosaic.version = 11 : i64} {
  func.func @_psa_s_kernel(%arg0: i32, %arg1: memref<2x16x256xf32, #tpu.memory_space<vmem>>, %arg2: memref<1x16xf32, #tpu.memory_space<vmem>>, %arg3: memref<8x16xf32, #tpu.memory_space<vmem>>, %arg4: memref<2x8xf32, #tpu.memory_space<vmem>>, %arg5: memref<2x1xf32, #tpu.memory_space<vmem>>, %arg6: memref<2x1xf32, #tpu.memory_space<vmem>>, %arg7: memref<2x1xf32, #tpu.memory_space<vmem>>, %arg8: memref<16x2xf32, #tpu.memory_space<vmem>>, %arg9: memref<16x1xf32, #tpu.memory_space<vmem>>, %arg10: memref<8x16xf32, #tpu.memory_space<vmem>>, %arg11: memref<8x16xf32, #tpu.memory_space<vmem>>, %arg12: memref<2x16x256xf32, #tpu.memory_space<vmem>>) attributes {dimension_semantics = [#tpu.dimension_semantics<parallel>], iteration_bounds = array<i64: 1>, scalar_prefetch = 0 : i64, scratch_operands = 0 : i64, tpu.core_type = #tpu.core_type<tc>, window_params = [{transform_indices = @transform_0, window_bounds = array<i64: 2, 16, 256>}, {pipeline_mode = #tpu.pipeline_mode<synchronous>, transform_indices = @transform_1, window_bounds = array<i64: 1, 16>}, {pipeline_mode = #tpu.pipeline_mode<synchronous>, transform_indices = @transform_2, window_bounds = array<i64: 8, 16>}, {pipeline_mode = #tpu.pipeline_mode<synchronous>, transform_indices = @transform_3, window_bounds = array<i64: 2, 8>}, {pipeline_mode = #tpu.pipeline_mode<synchronous>, transform_indices = @transform_4, window_bounds = array<i64: 2, 1>}, {pipeline_mode = #tpu.pipeline_mode<synchronous>, transform_indices = @transform_5, window_bounds = array<i64: 2, 1>}, {pipeline_mode = #tpu.pipeline_mode<synchronous>, transform_indices = @transform_6, window_bounds = array<i64: 2, 1>}, {pipeline_mode = #tpu.pipeline_mode<synchronous>, transform_indices = @transform_7, window_bounds = array<i64: 16, 2>}, {pipeline_mode = #tpu.pipeline_mode<synchronous>, transform_indices = @transform_8, window_bounds = array<i64: 16, 1>}, {pipeline_mode = #tpu.pipeline_mode<synchronous>, transform_indices = @transform_9, window_bounds = array<i64: 8, 16>}, {pipeline_mode = #tpu.pipeline_mode<synchronous>, transform_indices = @transform_10, window_bounds = array<i64: 8, 16>}, {transform_indices = @transform_11, window_bounds = array<i64: 2, 16, 256>}]} {
    %c0 = arith.constant 0 : index
    %c0_0 = arith.constant 0 : index
    %0 = vector.load %arg2[%c0, %c0_0] : memref<1x16xf32, #tpu.memory_space<vmem>>, vector<1x16xf32>
    %c0_1 = arith.constant 0 : index
    %c0_2 = arith.constant 0 : index
    %1 = vector.load %arg3[%c0_1, %c0_2] : memref<8x16xf32, #tpu.memory_space<vmem>>, vector<8x16xf32>
    %c0_3 = arith.constant 0 : index
    %c0_4 = arith.constant 0 : index
    %2 = vector.load %arg4[%c0_3, %c0_4] : memref<2x8xf32, #tpu.memory_space<vmem>>, vector<2x8xf32>
    %c0_5 = arith.constant 0 : index
    %c0_6 = arith.constant 0 : index
    %3 = vector.load %arg5[%c0_5, %c0_6] : memref<2x1xf32, #tpu.memory_space<vmem>>, vector<2x1xf32>
    %c0_7 = arith.constant 0 : index
    %c0_8 = arith.constant 0 : index
    %4 = vector.load %arg6[%c0_7, %c0_8] : memref<2x1xf32, #tpu.memory_space<vmem>>, vector<2x1xf32>
    %c0_9 = arith.constant 0 : index
    %c0_10 = arith.constant 0 : index
    %5 = vector.load %arg7[%c0_9, %c0_10] : memref<2x1xf32, #tpu.memory_space<vmem>>, vector<2x1xf32>
    %c0_11 = arith.constant 0 : index
    %c0_12 = arith.constant 0 : index
    %6 = vector.load %arg8[%c0_11, %c0_12] : memref<16x2xf32, #tpu.memory_space<vmem>>, vector<16x2xf32>
    %c0_13 = arith.constant 0 : index
    %c0_14 = arith.constant 0 : index
    %7 = vector.load %arg9[%c0_13, %c0_14] : memref<16x1xf32, #tpu.memory_space<vmem>>, vector<16x1xf32>
    %c0_15 = arith.constant 0 : index
    %c0_16 = arith.constant 0 : index
    %8 = vector.load %arg10[%c0_15, %c0_16] : memref<8x16xf32, #tpu.memory_space<vmem>>, vector<8x16xf32>
    %c0_17 = arith.constant 0 : index
    %c0_18 = arith.constant 0 : index
    %9 = vector.load %arg11[%c0_17, %c0_18] : memref<8x16xf32, #tpu.memory_space<vmem>>, vector<8x16xf32>
    %10 = tpu.iota {dimensions = array<i32: 0>} : vector<2x256xi32>
    %c0_19 = arith.constant 0 : index
    %c0_20 = arith.constant 0 : index
    %c0_21 = arith.constant 0 : index
    %11 = vector.load %arg1[%c0_19, %c0_20, %c0_21] : memref<2x16x256xf32, #tpu.memory_space<vmem>>, vector<1x16x256xf32>
    %12 = vector.shape_cast %11 : vector<1x16x256xf32> to vector<16x256xf32>
    %cst = arith.constant dense<0.000000e+00> : vector<1x256xf32>
    %13 = tpu.matmul %0, %12, %cst {dimension_numbers = #tpu.dot_dimension_numbers<[1], [0], [0], [1], [0, 0, 1, 1], [], []>} : vector<1x16xf32>, vector<16x256xf32>, vector<1x256xf32> -> vector<1x256xf32>
    %cst_22 = arith.constant dense<0xFF800000> : vector<1xf32>
    %14 = vector.multi_reduction <maximumf>, %13, %cst_22 [1] : vector<1x256xf32> to vector<1xf32>
    %15 = vector.shape_cast %14 : vector<1xf32> to vector<1x1xf32>
    %16 = vector.broadcast %15 : vector<1x1xf32> to vector<1x256xf32>
    %17 = arith.subf %13, %16 : vector<1x256xf32>
    %18 = math.exp %17 : vector<1x256xf32>
    %cst_23 = arith.constant dense<0.000000e+00> : vector<1xf32>
    %19 = vector.multi_reduction <add>, %18, %cst_23 [1] : vector<1x256xf32> to vector<1xf32>
    %20 = vector.shape_cast %19 : vector<1xf32> to vector<1x1xf32>
    %21 = tpu.reciprocal %20 : vector<1x1xf32> -> vector<1x1xf32>
    %c0_i32 = arith.constant 0 : i32
    %22 = vector.broadcast %c0_i32 : i32 to vector<2x256xi32>
    %23 = arith.cmpi eq, %10, %22 : vector<2x256xi32>
    %24 = vector.shape_cast %18 : vector<1x256xf32> to vector<1x256xf32>
    %25 = vector.broadcast %24 : vector<1x256xf32> to vector<2x256xf32>
    %cst_24 = arith.constant 3.906250e-03 : f32
    %26 = vector.broadcast %cst_24 : f32 to vector<2x256xf32>
    %27 = arith.select %23, %25, %26 : vector<2x256xi1>, vector<2x256xf32>
    %cst_25 = arith.constant dense<0.000000e+00> : vector<16x2xf32>
    %28 = tpu.matmul %12, %27, %cst_25 {dimension_numbers = #tpu.dot_dimension_numbers<[1], [1], [0], [0], [0, 0, 1, 0], [], []>} : vector<16x256xf32>, vector<2x256xf32>, vector<16x2xf32> -> vector<16x2xf32>
    %29 = vector.extract_strided_slice %28 {offsets = [0, 0], sizes = [16, 1], strides = [1, 1]} : vector<16x2xf32> to vector<16x1xf32>
    %30 = vector.extract_strided_slice %28 {offsets = [0, 1], sizes = [16, 1], strides = [1, 1]} : vector<16x2xf32> to vector<16x1xf32>
    %cst_26 = arith.constant dense<0.000000e+00> : vector<8x1xf32>
    %31 = tpu.matmul %1, %29, %cst_26 {dimension_numbers = #tpu.dot_dimension_numbers<[1], [0], [0], [1], [0, 0, 1, 1], [], []>} : vector<8x16xf32>, vector<16x1xf32>, vector<8x1xf32> -> vector<8x1xf32>
    %32 = vector.broadcast %21 : vector<1x1xf32> to vector<8x1xf32>
    %33 = arith.mulf %31, %32 : vector<8x1xf32>
    %cst_27 = arith.constant dense<0.000000e+00> : vector<2x1xf32>
    %34 = tpu.matmul %2, %33, %cst_27 {dimension_numbers = #tpu.dot_dimension_numbers<[1], [0], [0], [1], [0, 0, 1, 1], [], []>} : vector<2x8xf32>, vector<8x1xf32>, vector<2x1xf32> -> vector<2x1xf32>
    %35 = arith.addf %34, %3 : vector<2x1xf32>
    %cst_28 = arith.constant dense<0.000000e+00> : vector<1xf32>
    %36 = vector.multi_reduction <add>, %35, %cst_28 [0] : vector<2x1xf32> to vector<1xf32>
    %37 = vector.shape_cast %36 : vector<1xf32> to vector<1x1xf32>
    %cst_29 = arith.constant 2.000000e+00 : f32
    %38 = vector.broadcast %cst_29 : f32 to vector<1x1xf32>
    %39 = arith.divf %37, %38 : vector<1x1xf32>
    %40 = vector.broadcast %39 : vector<1x1xf32> to vector<2x1xf32>
    %41 = arith.subf %35, %40 : vector<2x1xf32>
    %42 = arith.mulf %41, %41 : vector<2x1xf32>
    %cst_30 = arith.constant dense<0.000000e+00> : vector<1xf32>
    %43 = vector.multi_reduction <add>, %42, %cst_30 [0] : vector<2x1xf32> to vector<1xf32>
    %44 = vector.shape_cast %43 : vector<1xf32> to vector<1x1xf32>
    %cst_31 = arith.constant 2.000000e+00 : f32
    %45 = vector.broadcast %cst_31 : f32 to vector<1x1xf32>
    %46 = arith.divf %44, %45 : vector<1x1xf32>
    %47 = vector.broadcast %39 : vector<1x1xf32> to vector<2x1xf32>
    %48 = arith.subf %35, %47 : vector<2x1xf32>
    %cst_32 = arith.constant 9.99999974E-6 : f32
    %49 = vector.broadcast %cst_32 : f32 to vector<1x1xf32>
    %50 = arith.addf %46, %49 : vector<1x1xf32>
    %51 = math.rsqrt %50 : vector<1x1xf32>
    %52 = vector.broadcast %51 : vector<1x1xf32> to vector<2x1xf32>
    %53 = arith.mulf %48, %52 : vector<2x1xf32>
    %54 = arith.mulf %53, %4 : vector<2x1xf32>
    %55 = arith.addf %54, %5 : vector<2x1xf32>
    %cst_33 = arith.constant 0.000000e+00 : f32
    %56 = vector.broadcast %cst_33 : f32 to vector<2x1xf32>
    %57 = arith.maximumf %55, %56 : vector<2x1xf32>
    %cst_34 = arith.constant dense<0.000000e+00> : vector<16x1xf32>
    %58 = tpu.matmul %6, %57, %cst_34 {dimension_numbers = #tpu.dot_dimension_numbers<[1], [0], [0], [1], [0, 0, 1, 1], [], []>} : vector<16x2xf32>, vector<2x1xf32>, vector<16x1xf32> -> vector<16x1xf32>
    %59 = arith.addf %58, %7 : vector<16x1xf32>
    %60 = arith.negf %59 : vector<16x1xf32>
    %61 = math.exp %60 : vector<16x1xf32>
    %cst_35 = arith.constant 1.000000e+00 : f32
    %62 = vector.broadcast %cst_35 : f32 to vector<16x1xf32>
    %63 = arith.addf %62, %61 : vector<16x1xf32>
    %64 = arith.divf %62, %63 : vector<16x1xf32>
    %65 = arith.mulf %64, %30 : vector<16x1xf32>
    %cst_36 = arith.constant dense<0.000000e+00> : vector<8x1xf32>
    %66 = tpu.matmul %8, %65, %cst_36 {dimension_numbers = #tpu.dot_dimension_numbers<[1], [0], [0], [1], [0, 0, 1, 1], [], []>} : vector<8x16xf32>, vector<16x1xf32>, vector<8x1xf32> -> vector<8x1xf32>
    %67 = tpu.transpose %64, [1, 0] : vector<16x1xf32> -> vector<1x16xf32>
    %68 = vector.broadcast %67 : vector<1x16xf32> to vector<8x16xf32>
    %69 = arith.mulf %9, %68 : vector<8x16xf32>
    %cst_37 = arith.constant dense<0.000000e+00> : vector<8x256xf32>
    %70 = tpu.matmul %69, %12, %cst_37 {dimension_numbers = #tpu.dot_dimension_numbers<[1], [0], [0], [1], [0, 0, 1, 1], [], []>} : vector<8x16xf32>, vector<16x256xf32>, vector<8x256xf32> -> vector<8x256xf32>
    %cst_38 = arith.constant dense<0xFF800000> : vector<8xf32>
    %71 = vector.multi_reduction <maximumf>, %70, %cst_38 [1] : vector<8x256xf32> to vector<8xf32>
    %72 = vector.shape_cast %71 : vector<8xf32> to vector<8x1xf32>
    %73 = vector.broadcast %72 : vector<8x1xf32> to vector<8x256xf32>
    %74 = arith.subf %70, %73 : vector<8x256xf32>
    %75 = math.exp %74 : vector<8x256xf32>
    %cst_39 = arith.constant dense<0.000000e+00> : vector<8xf32>
    %76 = vector.multi_reduction <add>, %75, %cst_39 [1] : vector<8x256xf32> to vector<8xf32>
    %77 = vector.shape_cast %76 : vector<8xf32> to vector<8x1xf32>
    %78 = tpu.reciprocal %77 : vector<8x1xf32> -> vector<8x1xf32>
    %79 = arith.mulf %66, %78 : vector<8x1xf32>
    %cst_40 = arith.constant dense<0.000000e+00> : vector<1x256xf32>
    %80 = tpu.matmul %79, %75, %cst_40 {dimension_numbers = #tpu.dot_dimension_numbers<[0], [0], [1], [1], [0, 1, 1, 1], [], []>} : vector<8x1xf32>, vector<8x256xf32>, vector<1x256xf32> -> vector<1x256xf32>
    %81 = arith.negf %80 : vector<1x256xf32>
    %82 = math.exp %81 : vector<1x256xf32>
    %cst_41 = arith.constant 1.000000e+00 : f32
    %83 = vector.broadcast %cst_41 : f32 to vector<1x256xf32>
    %84 = arith.addf %83, %82 : vector<1x256xf32>
    %85 = arith.divf %83, %84 : vector<1x256xf32>
    %86 = vector.broadcast %64 : vector<16x1xf32> to vector<16x256xf32>
    %87 = arith.mulf %12, %86 : vector<16x256xf32>
    %88 = vector.broadcast %85 : vector<1x256xf32> to vector<16x256xf32>
    %89 = arith.mulf %87, %88 : vector<16x256xf32>
    %c0_42 = arith.constant 0 : index
    %c0_43 = arith.constant 0 : index
    %c0_44 = arith.constant 0 : index
    %90 = vector.load %arg12[%c0_42, %c0_43, %c0_44] : memref<2x16x256xf32, #tpu.memory_space<vmem>>, vector<1x16x256xf32>
    %91 = vector.shape_cast %90 : vector<1x16x256xf32> to vector<16x256xf32>
    %92 = vector.shape_cast %89 : vector<16x256xf32> to vector<1x16x256xf32>
    tpu.vector_store %arg12[%c0_42, %c0_43, %c0_44], %92 {strides = array<i32>} : memref<2x16x256xf32, #tpu.memory_space<vmem>>, vector<1x16x256xf32>,
    %c1 = arith.constant 1 : index
    %c0_45 = arith.constant 0 : index
    %c0_46 = arith.constant 0 : index
    %93 = vector.load %arg1[%c1, %c0_45, %c0_46] : memref<2x16x256xf32, #tpu.memory_space<vmem>>, vector<1x16x256xf32>
    %94 = vector.shape_cast %93 : vector<1x16x256xf32> to vector<16x256xf32>
    %cst_47 = arith.constant dense<0.000000e+00> : vector<1x256xf32>
    %95 = tpu.matmul %0, %94, %cst_47 {dimension_numbers = #tpu.dot_dimension_numbers<[1], [0], [0], [1], [0, 0, 1, 1], [], []>} : vector<1x16xf32>, vector<16x256xf32>, vector<1x256xf32> -> vector<1x256xf32>
    %cst_48 = arith.constant dense<0xFF800000> : vector<1xf32>
    %96 = vector.multi_reduction <maximumf>, %95, %cst_48 [1] : vector<1x256xf32> to vector<1xf32>
    %97 = vector.shape_cast %96 : vector<1xf32> to vector<1x1xf32>
    %98 = vector.broadcast %97 : vector<1x1xf32> to vector<1x256xf32>
    %99 = arith.subf %95, %98 : vector<1x256xf32>
    %100 = math.exp %99 : vector<1x256xf32>
    %cst_49 = arith.constant dense<0.000000e+00> : vector<1xf32>
    %101 = vector.multi_reduction <add>, %100, %cst_49 [1] : vector<1x256xf32> to vector<1xf32>
    %102 = vector.shape_cast %101 : vector<1xf32> to vector<1x1xf32>
    %103 = tpu.reciprocal %102 : vector<1x1xf32> -> vector<1x1xf32>
    %c0_i32_50 = arith.constant 0 : i32
    %104 = vector.broadcast %c0_i32_50 : i32 to vector<2x256xi32>
    %105 = arith.cmpi eq, %10, %104 : vector<2x256xi32>
    %106 = vector.shape_cast %100 : vector<1x256xf32> to vector<1x256xf32>
    %107 = vector.broadcast %106 : vector<1x256xf32> to vector<2x256xf32>
    %cst_51 = arith.constant 3.906250e-03 : f32
    %108 = vector.broadcast %cst_51 : f32 to vector<2x256xf32>
    %109 = arith.select %105, %107, %108 : vector<2x256xi1>, vector<2x256xf32>
    %cst_52 = arith.constant dense<0.000000e+00> : vector<16x2xf32>
    %110 = tpu.matmul %94, %109, %cst_52 {dimension_numbers = #tpu.dot_dimension_numbers<[1], [1], [0], [0], [0, 0, 1, 0], [], []>} : vector<16x256xf32>, vector<2x256xf32>, vector<16x2xf32> -> vector<16x2xf32>
    %111 = vector.extract_strided_slice %110 {offsets = [0, 0], sizes = [16, 1], strides = [1, 1]} : vector<16x2xf32> to vector<16x1xf32>
    %112 = vector.extract_strided_slice %110 {offsets = [0, 1], sizes = [16, 1], strides = [1, 1]} : vector<16x2xf32> to vector<16x1xf32>
    %cst_53 = arith.constant dense<0.000000e+00> : vector<8x1xf32>
    %113 = tpu.matmul %1, %111, %cst_53 {dimension_numbers = #tpu.dot_dimension_numbers<[1], [0], [0], [1], [0, 0, 1, 1], [], []>} : vector<8x16xf32>, vector<16x1xf32>, vector<8x1xf32> -> vector<8x1xf32>
    %114 = vector.broadcast %103 : vector<1x1xf32> to vector<8x1xf32>
    %115 = arith.mulf %113, %114 : vector<8x1xf32>
    %cst_54 = arith.constant dense<0.000000e+00> : vector<2x1xf32>
    %116 = tpu.matmul %2, %115, %cst_54 {dimension_numbers = #tpu.dot_dimension_numbers<[1], [0], [0], [1], [0, 0, 1, 1], [], []>} : vector<2x8xf32>, vector<8x1xf32>, vector<2x1xf32> -> vector<2x1xf32>
    %117 = arith.addf %116, %3 : vector<2x1xf32>
    %cst_55 = arith.constant dense<0.000000e+00> : vector<1xf32>
    %118 = vector.multi_reduction <add>, %117, %cst_55 [0] : vector<2x1xf32> to vector<1xf32>
    %119 = vector.shape_cast %118 : vector<1xf32> to vector<1x1xf32>
    %cst_56 = arith.constant 2.000000e+00 : f32
    %120 = vector.broadcast %cst_56 : f32 to vector<1x1xf32>
    %121 = arith.divf %119, %120 : vector<1x1xf32>
    %122 = vector.broadcast %121 : vector<1x1xf32> to vector<2x1xf32>
    %123 = arith.subf %117, %122 : vector<2x1xf32>
    %124 = arith.mulf %123, %123 : vector<2x1xf32>
    %cst_57 = arith.constant dense<0.000000e+00> : vector<1xf32>
    %125 = vector.multi_reduction <add>, %124, %cst_57 [0] : vector<2x1xf32> to vector<1xf32>
    %126 = vector.shape_cast %125 : vector<1xf32> to vector<1x1xf32>
    %cst_58 = arith.constant 2.000000e+00 : f32
    %127 = vector.broadcast %cst_58 : f32 to vector<1x1xf32>
    %128 = arith.divf %126, %127 : vector<1x1xf32>
    %129 = vector.broadcast %121 : vector<1x1xf32> to vector<2x1xf32>
    %130 = arith.subf %117, %129 : vector<2x1xf32>
    %cst_59 = arith.constant 9.99999974E-6 : f32
    %131 = vector.broadcast %cst_59 : f32 to vector<1x1xf32>
    %132 = arith.addf %128, %131 : vector<1x1xf32>
    %133 = math.rsqrt %132 : vector<1x1xf32>
    %134 = vector.broadcast %133 : vector<1x1xf32> to vector<2x1xf32>
    %135 = arith.mulf %130, %134 : vector<2x1xf32>
    %136 = arith.mulf %135, %4 : vector<2x1xf32>
    %137 = arith.addf %136, %5 : vector<2x1xf32>
    %cst_60 = arith.constant 0.000000e+00 : f32
    %138 = vector.broadcast %cst_60 : f32 to vector<2x1xf32>
    %139 = arith.maximumf %137, %138 : vector<2x1xf32>
    %cst_61 = arith.constant dense<0.000000e+00> : vector<16x1xf32>
    %140 = tpu.matmul %6, %139, %cst_61 {dimension_numbers = #tpu.dot_dimension_numbers<[1], [0], [0], [1], [0, 0, 1, 1], [], []>} : vector<16x2xf32>, vector<2x1xf32>, vector<16x1xf32> -> vector<16x1xf32>
    %141 = arith.addf %140, %7 : vector<16x1xf32>
    %142 = arith.negf %141 : vector<16x1xf32>
    %143 = math.exp %142 : vector<16x1xf32>
    %cst_62 = arith.constant 1.000000e+00 : f32
    %144 = vector.broadcast %cst_62 : f32 to vector<16x1xf32>
    %145 = arith.addf %144, %143 : vector<16x1xf32>
    %146 = arith.divf %144, %145 : vector<16x1xf32>
    %147 = arith.mulf %146, %112 : vector<16x1xf32>
    %cst_63 = arith.constant dense<0.000000e+00> : vector<8x1xf32>
    %148 = tpu.matmul %8, %147, %cst_63 {dimension_numbers = #tpu.dot_dimension_numbers<[1], [0], [0], [1], [0, 0, 1, 1], [], []>} : vector<8x16xf32>, vector<16x1xf32>, vector<8x1xf32> -> vector<8x1xf32>
    %149 = tpu.transpose %146, [1, 0] : vector<16x1xf32> -> vector<1x16xf32>
    %150 = vector.broadcast %149 : vector<1x16xf32> to vector<8x16xf32>
    %151 = arith.mulf %9, %150 : vector<8x16xf32>
    %cst_64 = arith.constant dense<0.000000e+00> : vector<8x256xf32>
    %152 = tpu.matmul %151, %94, %cst_64 {dimension_numbers = #tpu.dot_dimension_numbers<[1], [0], [0], [1], [0, 0, 1, 1], [], []>} : vector<8x16xf32>, vector<16x256xf32>, vector<8x256xf32> -> vector<8x256xf32>
    %cst_65 = arith.constant dense<0xFF800000> : vector<8xf32>
    %153 = vector.multi_reduction <maximumf>, %152, %cst_65 [1] : vector<8x256xf32> to vector<8xf32>
    %154 = vector.shape_cast %153 : vector<8xf32> to vector<8x1xf32>
    %155 = vector.broadcast %154 : vector<8x1xf32> to vector<8x256xf32>
    %156 = arith.subf %152, %155 : vector<8x256xf32>
    %157 = math.exp %156 : vector<8x256xf32>
    %cst_66 = arith.constant dense<0.000000e+00> : vector<8xf32>
    %158 = vector.multi_reduction <add>, %157, %cst_66 [1] : vector<8x256xf32> to vector<8xf32>
    %159 = vector.shape_cast %158 : vector<8xf32> to vector<8x1xf32>
    %160 = tpu.reciprocal %159 : vector<8x1xf32> -> vector<8x1xf32>
    %161 = arith.mulf %148, %160 : vector<8x1xf32>
    %cst_67 = arith.constant dense<0.000000e+00> : vector<1x256xf32>
    %162 = tpu.matmul %161, %157, %cst_67 {dimension_numbers = #tpu.dot_dimension_numbers<[0], [0], [1], [1], [0, 1, 1, 1], [], []>} : vector<8x1xf32>, vector<8x256xf32>, vector<1x256xf32> -> vector<1x256xf32>
    %163 = arith.negf %162 : vector<1x256xf32>
    %164 = math.exp %163 : vector<1x256xf32>
    %cst_68 = arith.constant 1.000000e+00 : f32
    %165 = vector.broadcast %cst_68 : f32 to vector<1x256xf32>
    %166 = arith.addf %165, %164 : vector<1x256xf32>
    %167 = arith.divf %165, %166 : vector<1x256xf32>
    %168 = vector.broadcast %146 : vector<16x1xf32> to vector<16x256xf32>
    %169 = arith.mulf %94, %168 : vector<16x256xf32>
    %170 = vector.broadcast %167 : vector<1x256xf32> to vector<16x256xf32>
    %171 = arith.mulf %169, %170 : vector<16x256xf32>
    %c1_69 = arith.constant 1 : index
    %c0_70 = arith.constant 0 : index
    %c0_71 = arith.constant 0 : index
    %172 = vector.load %arg12[%c1_69, %c0_70, %c0_71] : memref<2x16x256xf32, #tpu.memory_space<vmem>>, vector<1x16x256xf32>
    %173 = vector.shape_cast %172 : vector<1x16x256xf32> to vector<16x256xf32>
    %174 = vector.shape_cast %171 : vector<16x256xf32> to vector<1x16x256xf32>
    tpu.vector_store %arg12[%c1_69, %c0_70, %c0_71], %174 {strides = array<i32>} : memref<2x16x256xf32, #tpu.memory_space<vmem>>, vector<1x16x256xf32>,
    return
  }
  func.func @transform_0(%arg0: i32) -> (i32, i32, i32) {
    %c0_i32 = arith.constant 0 : i32
    %c0_i32_0 = arith.constant 0 : i32
    %c0_i32_1 = arith.constant 0 : i32
    return %arg0, %c0_i32, %c0_i32_0 : i32, i32, i32
  }
  func.func @transform_1(%arg0: i32) -> (i32, i32) {
    %c0_i32 = arith.constant 0 : i32
    %c0_i32_0 = arith.constant 0 : i32
    %c0_i32_1 = arith.constant 0 : i32
    return %c0_i32, %c0_i32_0 : i32, i32
  }
  func.func @transform_2(%arg0: i32) -> (i32, i32) {
    %c0_i32 = arith.constant 0 : i32
    %c0_i32_0 = arith.constant 0 : i32
    %c0_i32_1 = arith.constant 0 : i32
    return %c0_i32, %c0_i32_0 : i32, i32
  }
  func.func @transform_3(%arg0: i32) -> (i32, i32) {
    %c0_i32 = arith.constant 0 : i32
    %c0_i32_0 = arith.constant 0 : i32
    %c0_i32_1 = arith.constant 0 : i32
    return %c0_i32, %c0_i32_0 : i32, i32
  }
  func.func @transform_4(%arg0: i32) -> (i32, i32) {
    %c0_i32 = arith.constant 0 : i32
    %c0_i32_0 = arith.constant 0 : i32
    %c0_i32_1 = arith.constant 0 : i32
    return %c0_i32, %c0_i32_0 : i32, i32
  }
  func.func @transform_5(%arg0: i32) -> (i32, i32) {
    %c0_i32 = arith.constant 0 : i32
    %c0_i32_0 = arith.constant 0 : i32
    %c0_i32_1 = arith.constant 0 : i32
    return %c0_i32, %c0_i32_0 : i32, i32
  }
  func.func @transform_6(%arg0: i32) -> (i32, i32) {
    %c0_i32 = arith.constant 0 : i32
    %c0_i32_0 = arith.constant 0 : i32
    %c0_i32_1 = arith.constant 0 : i32
    return %c0_i32, %c0_i32_0 : i32, i32
  }
  func.func @transform_7(%arg0: i32) -> (i32, i32) {
    %c0_i32 = arith.constant 0 : i32
    %c0_i32_0 = arith.constant 0 : i32
    %c0_i32_1 = arith.constant 0 : i32
    return %c0_i32, %c0_i32_0 : i32, i32
  }
  func.func @transform_8(%arg0: i32) -> (i32, i32) {
    %c0_i32 = arith.constant 0 : i32
    %c0_i32_0 = arith.constant 0 : i32
    %c0_i32_1 = arith.constant 0 : i32
    return %c0_i32, %c0_i32_0 : i32, i32
  }
  func.func @transform_9(%arg0: i32) -> (i32, i32) {
    %c0_i32 = arith.constant 0 : i32
    %c0_i32_0 = arith.constant 0 : i32
    %c0_i32_1 = arith.constant 0 : i32
    return %c0_i32, %c0_i32_0 : i32, i32
  }
  func.func @transform_10(%arg0: i32) -> (i32, i32) {
    %c0_i32 = arith.constant 0 : i32
    %c0_i32_0 = arith.constant 0 : i32
    %c0_i32_1 = arith.constant 0 : i32
    return %c0_i32, %c0_i32_0 : i32, i32
  }
  func.func @transform_11(%arg0: i32) -> (i32, i32, i32) {
    %c0_i32 = arith.constant 0 : i32
    %c0_i32_0 = arith.constant 0 : i32
    %c0_i32_1 = arith.constant 0 : i32
    return %arg0, %c0_i32, %c0_i32_0 : i32, i32, i32
  }
}

</mosaic_0001>

<bundles_post_ra>
// kernel: tpu_custom_call.1
= control target key start
LH: loop header
LB: loop body
LE: loop exit
PB: predicated region body
PF: predicated region fallthrough
CT: control target
= control target key end

     0   :  { %16 = vsyncpa [#allocation3], 0  ;;  %s2282_s0 = inlined_call_operand.hbm [shape: f32[2,16,256], index: 0, kind: input, shape index: {}]   ;;  %s2283_s1 = inlined_call_operand.vmem [shape: f32[1,16], index: 1, kind: input, shape index: {}]   ;;  %s2284_s2 = inlined_call_operand.vmem [shape: f32[8,16], index: 2, kind: input, shape index: {}]   ;;  %s2285_s3 = inlined_call_operand.vmem [shape: f32[2,8], index: 3, kind: input, shape index: {}]   ;;  %s2286_s4 = inlined_call_operand.vmem [shape: f32[2,1], index: 4, kind: input, shape index: {}]   ;;  %s2287_s5 = inlined_call_operand.vmem [shape: f32[2,1], index: 5, kind: input, shape index: {}]   ;;  %s2288_s6 = inlined_call_operand.vmem [shape: f32[2,1], index: 6, kind: input, shape index: {}]   ;;  %s2289_s7 = inlined_call_operand.vmem [shape: f32[16,2], index: 7, kind: input, shape index: {}]   ;;  %s2290_s8 = inlined_call_operand.vmem [shape: f32[16,1], index: 8, kind: input, shape index: {}]   ;;  %s2291_s9 = inlined_call_operand.vmem [shape: f32[8,16], index: 9, kind: input, shape index: {}]   ;;  %s2292_s10 = inlined_call_operand.vmem [shape: f32[8,16], index: 10, kind: input, shape index: {}]   ;;  %s2293_s11 = inlined_call_operand.hbm [shape: f32[2,16,256], index: 11, kind: output, shape index: {}]  }
   0x1   :  { %17 = vsyncpa [#allocation4], 0  ;;  %s1933_s17 = smov [#allocation2]   ;;  %s1885_s21 = scalar_lea.hbm %s2282_s0, 1024 }
   0x2   :  { %s23_s18 = sshll.u32 %s1933_s17, 4  ;;  %p1886_p0 = scmp.ne.s32.totalorder %s2282_s0, %s1885_s21  ;;  %s24_s18 = int_to_ptr.vmem [resolvable:$true] %s23_s18 }
   0x3   :  { %p1889_p1 = scmp.lt.u32.totalorder %s1885_s21, %s2282_s0 }
   0x5   :  { %p1891_p2 = pnand %p1889_p1, %p1886_p0 }
   0x7   :  { %1894 = shalt.err (!%p1891_p2)
}
   0x8   :  { %s1895_s26 = scalar_lea.vmem %s24_s18, 1024  ;;  %p1900_p4 = scmp.lt.s32.totalorder %s24_s18, %s24_s18 }
   0x9   :  { %p1896_p3 = scmp.ne.s32.totalorder %s24_s18, %s1895_s26  ;;  %p1901_p5 = scmp.lt.s32.totalorder %s1895_s26, %s1895_s26 }
   0xb   :  { %p1902_p6 = por %p1901_p5, %p1900_p4 }
   0xd   :  { %p1903_p7 = pnand %p1902_p6, %p1896_p3 }
   0xf   :  { %1906 = shalt.err (!%p1903_p7)
}
  0x10   :  { %s1934_s27 = smov 256   ;;  %s1935_s28 = smov 16  }
  0x11   :  { %29 = dma.hbm_to_vmem [thread:$0]  %s2282_s0, 1024, %s24_s18, [#allocation3], %s1934_s27, %s1934_s27, %s1935_s28  }
  0x12   :  { %1929 = dma.done.wait [#allocation3], 1024  }
  0x13   :  { %1930 = vsyncadd [#allocation3], 4294966272  ;;  %v1936_v0 = vmov 0.0   ;;  %v2018_v1 = vld [vmem:[#allocation2 + $0x8] sm:$0xff]  ;;  %v2020_v2 = vld [vmem:[#allocation2 + $0x18] sm:$0xff]  ;;  %vm71_vm0 = vcmask 130048   ;;  %v65_v18 = vlaneseq }
  0x14   :  { %139 = vmatprep.mubr.f32.mxu0 %v1936_v0  ;;  %v2022_v3 = vld [vmem:[#allocation2] sm:$0xff]  ;;  %v2026_v4 = vpack.c.bf16 %v2020_v2, %v2018_v1  ;;  %v2028_v5 = vld [vmem:[#allocation2 + $0x10] sm:$0xff]  ;;  %239 = vmatprep.mubr.f32.mxu1 %v2018_v1  ;;  %vm146_vm1 = vcmask 1040384   ;;  %v1937_v30 = vmov 0.0|0.0   ;;  %vm1938_vm3 = vmmov 0  }
  0x15   :  { %v2033_v6 = vpack.c.bf16 %v2028_v5, %v2022_v3  ;;  %v2040_v7 = vld [vmem:[%s2283_s1] sm:$0x1]  ;;  %v2046_v19 = vshrl.u32 %v65_v18, 7  ;;  %s1939_s1 = smov 127   ;;  %vm328_vm4 = vcmask 64512   ;;  %vm428_vm5 = vcmask 15360  }
  0x16   :  { %1787 = vmatprep.subr.bf16.mxu0 %v2026_v4  ;;  %v2073_v36 = vld [vmem:[%s2284_s2] sm:$0xff]  ;;  %vm402_vm6 = vcmask 1024   ;;  %vm435_vm7 = vcmask 1041408  }
  0x17   :  { %1789 = vmatpush1.bf16.msra.mxu0 %v2033_v6  ;;  %v2049_v20 = vsub.s32 0, %v2046_v19  ;;  %vm164_vm2 = vcmp.eq.s32.totalorder %v2046_v19, 0  ;;  %v2084_v43 = vld [vmem:[%s2285_s3] sm:$0x3] }
  0x18   :  { %1790 = vmatprep.subr.bf16.mxu0 %v1937_v30  ;;  %v2094_v44 = vld [vmem:[%s2289_s7] sm:$0xff] }
  0x19   :  { %v2101_v45 = vld [vmem:[%s2286_s4] sm:$0x3] }
  0x1a   :  { %1690 = vmatmul.mubr.msk.f32.vlgmr.msra.gmra.mrb[0].mxu0 %vm71_vm0, %v2040_v7 }
  0x1b   :  { %1742 = vmatprep.mubr.msk.f32.mxu0 %vm1938_vm3, %v1936_v0 }
  0xed   :  { %v141_v8 = vpop.f32.mrb[0].mxu0 }
  0xee   :  { %v143_v9 = vpop.f32.mrb[1].mxu0  ;;  %v147_v10 = vsel %vm146_vm1, %v141_v8, -inf }
  0xef   :  { %v148_v11 = vsel %vm146_vm1, %v143_v9, -inf }
  0xf0   :  { %v149_v12 = vmax.f32 %v147_v10, %v148_v11 }
  0xf2   :  { %150 = vmax.xlane.f32.xlu0 %v149_v12 }
 0x17f   :  { %v151_v13 = vpop.xlane.xlu0 %150 }
 0x180   :  { %v152_v14 = vsub.f32 %v141_v8, %v151_v13  ;;  %v153_v15 = vsub.f32 %v143_v9, %v151_v13  ;;  %v2109_v13 = vld [vmem:[%s2287_s5] sm:$0x3] }
 0x182   :  { %v154_v16 = vmul.f32 1.442695, %v152_v14  ;;  %v156_v17 = vmul.f32 1.442695, %v153_v15  ;;  %v2114_v15 = vld [vmem:[%s2288_s6] sm:$0x3] }
 0x184   :  { %1825 = vpow2.f32 %v154_v16 }
 0x185   :  { %1827 = vpow2.f32 %v156_v17 }
 0x18e   :  { %v1826_v21 = vpop.eup %1825 }
 0x18f   :  { %v1828_v22 = vpop.eup %1827  ;;  %v158_v23 = vsel %vm146_vm1, %v1826_v21, 0.0  ;;  %v168_v24 = vrot.slane %v1826_v21, %v2049_v20  ;;  %v2121_v21 = vld [vmem:[%s2289_s7 + $0x8] sm:$0xff] }
 0x190   :  { %v172_v25 = vrot.slane %v1828_v22, %v2049_v20  ;;  %v159_v26 = vsel %vm146_vm1, %v1828_v22, 0.0  ;;  %v2133_v22 = vld [vmem:[%s2290_s8 + $0x8] sm:$0xff] }
 0x191   :  { %v160_v27 = vadd.f32 %v159_v26, %v158_v23  ;;  %v173_v28 = vsel %vm164_vm2, %v168_v24, 0.00390625  ;;  %v2138_v23 = vld [vmem:[%s2290_s8] sm:$0xff] }
 0x192   :  { %v174_v29 = vsel %vm164_vm2, %v172_v25, 0.00390625 }
 0x193   :  { %175 = vmatprep.subr.mxu1 %v174_v29  ;;  %161 = vadd.xlane.f32.xlu0 %v160_v27 }
 0x194   :  { %176 = vmatpush1.xpose.msra.mxu1 %v173_v28 }
 0x197   :  { %240 = vmatmul.mubr.f32.vlgmr.msra.gmra.mrb[0].mxu1 %v2022_v3 }
 0x198   :  { %244 = vmatprep.mubr.f32.mxu1 %v2020_v2 }
 0x19b   :  { %245 = vmatmul.mubr.f32.gmra.mrb[2].mxu1 %v2028_v5 }
 0x19c   :  { %1752 = vmatprep.mubr.msk.f32.mxu1 %vm428_vm5, %v2094_v44 }
 0x220   :  { %v162_v37 = vpop.xlane.xlu0 %161 }
 0x221   :  { %1829 = vrcp.f32 %v162_v37  ;;  %v2148_v37 = vld [vmem:[#allocation2 + $0x28] sm:$0xff] }
 0x22b   :  { %v1830_v38 = vpop.eup %1829 }
 0x22c   :  { %v326_v39 = vrot.slane %v1830_v38, %v2049_v20  ;;  %v2150_v38 = vld [vmem:[#allocation2 + $0x38] sm:$0xff] }
 0x26a   :  { %v241_v31 = vpop.f32.mrb[0].mxu1 }
 0x26b   :  { %v243_v32 = vpop.f32.mrb[1].mxu1  ;;  %528 = vrot.lane.b32.xlu0 %v241_v31, %s1939_s1 }
 0x26e   :  { %v2067_v33 = vpop.f32.mrb[2].mxu1 }
 0x26f   :  { %v1791_v34 = vpack.c.bf16 %v2067_v33, %v241_v31  ;;  %v248_v35 = vpop.f32.mrb[3].mxu1 }
 0x271   :  { %1792 = vmatpush3.bf16.msra.mxu0 %v1791_v34 }
 0x272   :  { %1745 = vmatprep.subr.mxu0 %v1936_v0 }
 0x274   :  { %1743 = vmatmul.mubr.msk.f32.vlgmr.msra.gmra.mrb[2].mxu0 %vm71_vm0, %v2073_v36 }
 0x275   :  { %1747 = vmatprep.mubr.msk.f32.mxu0 %vm1938_vm3, %v1936_v0 }
 0x347   :  { %v319_v40 = vpop.f32.mrb[2].mxu0 }
 0x348   :  { %v327_v41 = vmul.f32 %v326_v39, %v319_v40  ;;  %v1744_v42 = vpop.f32.mrb[3].mxu0  ;;  %v2154_v39 = vpack.c.bf16 %v2150_v38, %v2148_v37  ;;  %v2159_v40 = vld [vmem:[#allocation2 + $0x20] sm:$0xff] }
 0x349   :  { %v2166_v42 = vld [vmem:[%s2292_s10] sm:$0xff] }
 0x34a   :  { %1746 = vmatpush3.msra.mxu0 %v327_v41  ;;  %v2161_v41 = vld [vmem:[#allocation2 + $0x30] sm:$0xff] }
 0x34b   :  { %1748 = vmatmul.mubr.msk.f32.vlgmr.msra.gmra.mrb[4].mxu0 %vm328_vm4, %v2084_v43  ;;  %1793 = vmatprep.subr.bf16.mxu0 %v1937_v30 }
 0x34c   :  { %1759 = vmatprep.mubr.msk.f32.mxu0 %vm1938_vm3, %v1936_v0 }
 0x41e   :  { %v398_v46 = vpop.f32.mrb[4].mxu0 }
 0x41f   :  { %v399_v47 = vadd.f32 %v398_v46, %v2101_v45  ;;  %v1749_v48 = vpop.f32.mrb[5].mxu0 }
 0x420   :  { %v2171_v48 = vpack.c.bf16 %v2161_v41, %v2159_v40 }
 0x421   :  { %v403_v49 = vsel %vm402_vm6, %v399_v47, 0.0 }
 0x422   :  { %v404_v50 = vrot.slane %v403_v49, 4 }
 0x424   :  { %v405_v51 = vadd.f32 %v404_v50, %v403_v49 }
 0x426   :  { %v406_v52 = vrot.slane %v405_v51, 2 }
 0x428   :  { %v407_v53 = vadd.f32 %v406_v52, %v405_v51 }
 0x42a   :  { %v408_v54 = vrot.slane %v407_v53, 1 }
 0x42c   :  { %v409_v55 = vadd.f32 %v408_v54, %v407_v53  ;;  %v2187_v54 = vld [vmem:[%s2291_s9] sm:$0xff]  ;;  %s1941_s9 = smov [#allocation5]  }
 0x42d   :  { %s1678_s29 = sshll.u32 %s1941_s9, 4  ;;  %s1679_s29 = int_to_ptr.vmem [resolvable:$true] %s1678_s29 }
 0x42e   :  { %v411_v56 = vmul.f32 0.5, %v409_v55  ;;  %s1907_s30 = scalar_lea.vmem %s1679_s29, 1024  ;;  %p1912_p9 = scmp.lt.s32.totalorder %s1679_s29, %s1679_s29 }
 0x42f   :  { %p1908_p8 = scmp.ne.s32.totalorder %s1679_s29, %s1907_s30  ;;  %p1913_p10 = scmp.lt.s32.totalorder %s1907_s30, %s1907_s30 }
 0x430   :  { %v412_v57 = vsub.f32 %v399_v47, %v411_v56 }
 0x431   :  { %p1914_p11 = por %p1913_p10, %p1912_p9 }
 0x432   :  { %v413_v58 = vmul.f32 %v412_v57, %v412_v57 }
 0x433   :  { %p1915_p12 = pnand %p1914_p11, %p1908_p8 }
 0x434   :  { %v414_v59 = vsel %vm402_vm6, %v413_v58, 0.0 }
 0x435   :  { %v415_v60 = vrot.slane %v414_v59, 4 }
 0x437   :  { %v416_v61 = vadd.f32 %v415_v60, %v414_v59 }
 0x439   :  { %v417_v62 = vrot.slane %v416_v61, 2 }
 0x43b   :  { %v418_v63 = vadd.f32 %v417_v62, %v416_v61 }
 0x43d   :  { %v419_v8 = vrot.slane %v418_v63, 1 }
 0x43f   :  { %v420_v9 = vadd.f32 %v419_v8, %v418_v63 }
 0x441   :  { %v421_v10 = vmul.f32 0.5, %v420_v9 }
 0x443   :  { %v422_v11 = vadd.f32 1e-05, %v421_v10 }
 0x445   :  { %1831 = vrsqrt.f32 %v422_v11 }
 0x44f   :  { %v1832_v12 = vpop.eup %1831 }
 0x450   :  { %v424_v14 = vmul.f32 %v1832_v12, %v412_v57 }
 0x452   :  { %v425_v16 = vmul.f32 %v424_v14, %v2109_v13 }
 0x454   :  { %v426_v17 = vadd.f32 %v425_v16, %v2114_v15 }
 0x456   :  { %v427_v18 = vmax.f32 %v426_v17, 0.0 }
 0x458   :  { %1750 = vmatprep.subr.msk.mxu1 %vm435_vm7, %v427_v18 }
 0x459   :  { %1751 = vmatpush3.msk.msra.mxu1 %vm435_vm7, %v427_v18 }
 0x45a   :  { %1753 = vmatmul.mubr.msk.f32.vlgmr.msra.gmra.mrb[4].mxu1 %vm428_vm5, %v2121_v21  ;;  %1797 = vmatprep.subr.bf16.mxu1 %v2026_v4 }
 0x45b   :  { %1799 = vmatpush1.bf16.msra.mxu1 %v2033_v6  ;;  %713 = vmatprep.mubr.f32.mxu1 %v1936_v0 }
 0x45c   :  { %1801 = vmatprep.subr.bf16.mxu1 %v2154_v39 }
 0x52d   :  { %v1754_v24 = vpop.f32.mrb[4].mxu1 }
 0x52e   :  { %v511_v25 = vadd.f32 %v1754_v24, %v2133_v22  ;;  %v505_v26 = vpop.f32.mrb[5].mxu1 }
 0x52f   :  { %v506_v4 = vadd.f32 %v505_v26, %v2138_v23 }
 0x530   :  { %v1697_v27 = vmul.f32 -1.442695, %v511_v25 }
 0x531   :  { %v1696_v6 = vmul.f32 -1.442695, %v506_v4 }
 0x532   :  { %1833 = vpow2.f32 %v1697_v27 }
 0x533   :  { %1835 = vpow2.f32 %v1696_v6 }
 0x53c   :  { %v1834_v28 = vpop.eup %1833 }
 0x53d   :  { %v1836_v29 = vpop.eup %1835  ;;  %v521_v32 = vadd.f32 1.0, %v1834_v28 }
 0x53e   :  { %v520_v31 = vadd.f32 1.0, %v1836_v29 }
 0x540   :  { %1837 = vrcp.f32 %v520_v31 }
 0x541   :  { %1839 = vrcp.f32 %v521_v32 }
 0x54a   :  { %v2142_v34 = vpop.eup %1837 }
 0x54b   :  { %609 = vxpose.xlu1.b32.start [1/2] (short) (narrow) %v2142_v34, 8  ;;  %v2145_v35 = vpop.eup %1839 }
 0x54f   :  { %610 = vxpose.xlu1.b32.end [2/2] (short) (narrow) %v2145_v35, 8 }
 0x56d   :  { %530 = vrot.lane.b32.xlu1 %v2067_v33, %s1939_s1  ;;  %v529_v33 = vpop.permute.xlu0 %528 }
 0x56e   :  { %v534_v51 = vmul.f32 %v2142_v34, %v529_v33 }
 0x5cb   :  { %v625_v46 = vpop.trf.xlu1 }
 0x5cc   :  { %v644_v47 = vrot.slane %v625_v46, %v2049_v20 }
 0x5ce   :  { %v645_v49 = vmul.f32 %v644_v47, %v2166_v42 }
 0x5d0   :  { %1699 = vmatmul.mubr.msk.f32.vlgmr.msra.gmra.mrb[6].mxu1 %vm71_vm0, %v645_v49 }
 0x5d1   :  { %1803 = vmatpush1.bf16.msra.mxu1 %v2171_v48  ;;  %951 = vmatprep.mubr.f32.mxu1 %v1936_v0 }
 0x5d2   :  { %1804 = vmatprep.subr.bf16.mxu1 %v1937_v30 }
 0x5d4   :  { %1703 = vmatmul.mubr.msk.f32.vlgmr.msra.gmra.mrb[8].mxu1 %vm71_vm0, %v2040_v7 }
 0x5d5   :  { %1766 = vmatprep.mubr.msk.f32.mxu1 %vm1938_vm3, %v1936_v0 }
 0x5df   :  { %v531_v50 = vpop.permute.xlu1 %530 }
 0x5e0   :  { %v535_v52 = vmul.f32 %v2145_v35, %v531_v50 }
 0x5e2   :  { %v1794_v53 = vpack.c.bf16 %v535_v52, %v534_v51 }
 0x5e4   :  { %1795 = vmatpush3.bf16.msra.mxu0 %v1794_v53 }
 0x5e7   :  { %1760 = vmatmul.mubr.msk.f32.vlgmr.msra.gmra.mrb[6].mxu0 %vm71_vm0, %v2187_v54 }
 0x5e8   :  { %833 = vmatprep.mubr.f32.mxu0 %v1936_v0 }
 0x6a3   :  { %v715_v7 = vpop.f32.mrb[6].mxu1 }
 0x6a4   :  { %v717_v55 = vpop.f32.mrb[7].mxu1 }
 0x6a5   :  { %v720_v56 = vmax.f32 %v715_v7, %v717_v55 }
 0x6a7   :  { %721 = vmax.xlane.f32.xlu0 %v720_v56  ;;  %v953_v57 = vpop.f32.mrb[8].mxu1 }
 0x6a8   :  { %v958_v58 = vsel %vm146_vm1, %v953_v57, -inf  ;;  %v955_v59 = vpop.f32.mrb[9].mxu1 }
 0x6a9   :  { %v959_v60 = vsel %vm146_vm1, %v955_v59, -inf }
 0x6aa   :  { %v960_v61 = vmax.f32 %v958_v58, %v959_v60 }
 0x6ac   :  { %961 = vmax.xlane.f32.xlu0 %v960_v61 }
 0x6ba   :  { %v605_v32 = vpop.f32.mrb[6].mxu0 }
 0x6bb   :  { %v1761_v46 = vpop.f32.mrb[7].mxu0 }
 0x734   :  { %v722_v62 = vpop.xlane.xlu0 %721 }
 0x735   :  { %v723_v63 = vsub.f32 %v715_v7, %v722_v62  ;;  %v724_v8 = vsub.f32 %v717_v55, %v722_v62 }
 0x737   :  { %v725_v9 = vmul.f32 1.442695, %v723_v63  ;;  %v727_v10 = vmul.f32 1.442695, %v724_v8 }
 0x739   :  { %1841 = vpow2.f32 %v725_v9  ;;  %v962_v11 = vpop.xlane.xlu0 %961 }
 0x73a   :  { %1843 = vpow2.f32 %v727_v10  ;;  %v963_v12 = vsub.f32 %v953_v57, %v962_v11  ;;  %v964_v14 = vsub.f32 %v955_v59, %v962_v11 }
 0x73c   :  { %v965_v16 = vmul.f32 1.442695, %v963_v12  ;;  %v967_v17 = vmul.f32 1.442695, %v964_v14 }
 0x73e   :  { %1845 = vpow2.f32 %v965_v16 }
 0x73f   :  { %1847 = vpow2.f32 %v967_v17 }
 0x743   :  { %v1842_v18 = vpop.eup %1841 }
 0x744   :  { %v1844_v24 = vpop.eup %1843 }
 0x745   :  { %769 = vmatprep.subr.mxu0 %v1844_v24  ;;  %v729_v25 = vadd.f32 %v1844_v24, %v1842_v18 }
 0x746   :  { %770 = vmatpush1.msra.mxu0 %v1842_v18 }
 0x747   :  { %730 = vadd.xlane.f32.xlu1 %v729_v25 }
 0x748   :  { %v1846_v26 = vpop.eup %1845 }
 0x749   :  { %v1848_v4 = vpop.eup %1847  ;;  %v969_v27 = vsel %vm146_vm1, %v1846_v26, 0.0  ;;  %v978_v50 = vrot.slane %v1846_v26, %v2049_v20 }
 0x74a   :  { %v982_v6 = vrot.slane %v1848_v4, %v2049_v20  ;;  %v970_v28 = vsel %vm146_vm1, %v1848_v4, 0.0 }
 0x74b   :  { %v971_v29 = vadd.f32 %v970_v28, %v969_v27  ;;  %v983_v52 = vsel %vm164_vm2, %v978_v50, 0.00390625 }
 0x74c   :  { %v984_v31 = vsel %vm164_vm2, %v982_v6, 0.00390625 }
 0x74d   :  { %985 = vmatprep.subr.mxu0 %v984_v31  ;;  %972 = vadd.xlane.f32.xlu1 %v971_v29 }
 0x7d4   :  { %v731_v47 = vpop.xlane.xlu1 %730 }
 0x7d5   :  { %1849 = vrcp.f32 %v731_v47 }
 0x7df   :  { %v1850_v49 = vpop.eup %1849 }
 0x7e0   :  { %v733_v33 = vmul.f32 %v1850_v49, %v605_v32 }
 0x7e2   :  { %734 = vxpose.xlu0.b32.start.end [1/1] (short) (narrow) %v733_v33, 8 }
 0x862   :  { %v750_v51 = vpop.trf.xlu0 }
 0x863   :  { %1700 = vmatmul.mubr.msk.f32.vlgmr.msra.gmra.mrb[8].mxu0 %vm328_vm4, %v750_v51 }
 0x864   :  { %986 = vmatpush1.xpose.msra.mxu0 %v983_v52  ;;  %1049 = vmatprep.mubr.f32.mxu0 %v2148_v37 }
 0x867   :  { %1050 = vmatmul.mubr.f32.vlgmr.msra.gmra.mrb[10].mxu0 %v2159_v40 }
 0x868   :  { %1054 = vmatprep.mubr.f32.mxu0 %v2150_v38 }
 0x86b   :  { %1055 = vmatmul.mubr.f32.gmra.mrb[12].mxu0 %v2161_v41 }
 0x86c   :  { %1776 = vmatprep.mubr.msk.f32.mxu0 %vm428_vm5, %v2094_v44  ;;  %v973_v44 = vpop.xlane.xlu1 %972 }
 0x86d   :  { %1851 = vrcp.f32 %v973_v44 }
 0x877   :  { %v1852_v59 = vpop.eup %1851 }
 0x878   :  { %v1133_v60 = vrot.slane %v1852_v59, %v2049_v20 }
 0x936   :  { %v2209_v53 = vpop.f32.mrb[8].mxu0 }
 0x937   :  { %v2211_v7 = vpop.f32.mrb[9].mxu0 }
 0x93a   :  { %v1051_v55 = vpop.f32.mrb[10].mxu0 }
 0x93b   :  { %1321 = vrot.lane.b32.xlu0 %v1051_v55, %s1939_s1  ;;  %v1053_v19 = vpop.f32.mrb[11].mxu0 }
 0x93e   :  { %v2214_v56 = vpop.f32.mrb[12].mxu0 }
 0x93f   :  { %v1805_v57 = vpack.c.bf16 %v2214_v56, %v1051_v55  ;;  %v1058_v58 = vpop.f32.mrb[13].mxu0 }
 0x941   :  { %1806 = vmatpush3.bf16.msra.mxu1 %v1805_v57 }
 0x942   :  { %1769 = vmatprep.subr.mxu1 %v1936_v0 }
 0x944   :  { %1767 = vmatmul.mubr.msk.f32.vlgmr.msra.gmra.mrb[10].mxu1 %vm71_vm0, %v2073_v36 }
 0x945   :  { %1771 = vmatprep.mubr.msk.f32.mxu1 %vm1938_vm3, %v1936_v0 }
 0x9ad   :  { %v1322_v59 = vpop.permute.xlu0 %1321 }
 0xa17   :  { %v1126_v61 = vpop.f32.mrb[10].mxu1 }
 0xa18   :  { %v1134_v62 = vmul.f32 %v1133_v60, %v1126_v61  ;;  %v1768_v63 = vpop.f32.mrb[11].mxu1 }
 0xa1a   :  { %1770 = vmatpush3.msra.mxu1 %v1134_v62 }
 0xa1b   :  { %1772 = vmatmul.mubr.msk.f32.vlgmr.msra.gmra.mrb[12].mxu1 %vm328_vm4, %v2084_v43  ;;  %1807 = vmatprep.subr.bf16.mxu1 %v1937_v30 }
 0xa1c   :  { %1783 = vmatprep.mubr.msk.f32.mxu1 %vm1938_vm3, %v1936_v0 }
 0xaee   :  { %v1201_v36 = vpop.f32.mrb[12].mxu1 }
 0xaef   :  { %v1202_v8 = vadd.f32 %v1201_v36, %v2101_v45  ;;  %v1773_v9 = vpop.f32.mrb[13].mxu1 }
 0xaf0   :  { %v1940_v9 = vmov 0  }
 0xaf1   :  { %v1205_v10 = vsel %vm402_vm6, %v1202_v8, 0.0 }
 0xaf2   :  { %v1206_v11 = vrot.slane %v1205_v10, 4 }
 0xaf4   :  { %v1207_v12 = vadd.f32 %v1206_v11, %v1205_v10 }
 0xaf6   :  { %v1208_v14 = vrot.slane %v1207_v12, 2 }
 0xaf8   :  { %v1209_v16 = vadd.f32 %v1208_v14, %v1207_v12 }
 0xafa   :  { %v1210_v17 = vrot.slane %v1209_v16, 1 }
 0xafc   :  { %v1211_v18 = vadd.f32 %v1210_v17, %v1209_v16 }
 0xafe   :  { %v1212_v24 = vmul.f32 0.5, %v1211_v18 }
 0xb00   :  { %v1213_v25 = vsub.f32 %v1202_v8, %v1212_v24  ;;  %v1701_v24 = vmul.f32 -1.442695, %v2209_v53 }
 0xb02   :  { %v1214_v43 = vmul.f32 %v1213_v25, %v1213_v25 }
 0xb04   :  { %v1215_v30 = vsel %vm402_vm6, %v1214_v43, 0.0 }
 0xb05   :  { %v1216_v26 = vrot.slane %v1215_v30, 4 }
 0xb07   :  { %v1217_v4 = vadd.f32 %v1216_v26, %v1215_v30 }
 0xb09   :  { %v1218_v27 = vrot.slane %v1217_v4, 2 }
 0xb0b   :  { %v1219_v6 = vadd.f32 %v1218_v27, %v1217_v4 }
 0xb0d   :  { %v1220_v28 = vrot.slane %v1219_v6, 1 }
 0xb0f   :  { %v1221_v45 = vadd.f32 %v1220_v28, %v1219_v6 }
 0xb11   :  { %v1222_v29 = vmul.f32 0.5, %v1221_v45 }
 0xb13   :  { %v1223_v31 = vadd.f32 1e-05, %v1222_v29 }
 0xb15   :  { %1853 = vrsqrt.f32 %v1223_v31 }
 0xb1f   :  { %v1854_v32 = vpop.eup %1853 }
 0xb20   :  { %v1225_v46 = vmul.f32 %v1854_v32, %v1213_v25  ;;  %v1702_v25 = vmul.f32 -1.442695, %v2211_v7 }
 0xb22   :  { %v1226_v47 = vmul.f32 %v1225_v46, %v2109_v13 }
 0xb24   :  { %v1227_v49 = vadd.f32 %v1226_v47, %v2114_v15 }
 0xb26   :  { %v1228_v33 = vmax.f32 %v1227_v49, 0.0 }
 0xb28   :  { %1774 = vmatprep.subr.msk.mxu0 %vm435_vm7, %v1228_v33 }
 0xb29   :  { %1775 = vmatpush3.msk.msra.mxu0 %vm435_vm7, %v1228_v33 }
 0xb2a   :  { %1777 = vmatmul.mubr.msk.f32.vlgmr.msra.gmra.mrb[14].mxu0 %vm428_vm5, %v2121_v21  ;;  %1811 = vmatprep.subr.bf16.mxu0 %v2154_v39 }
 0xb2b   :  { %1813 = vmatpush1.bf16.msra.mxu0 %v2171_v48  ;;  %1503 = vmatprep.mubr.f32.mxu0 %v1936_v0 }
 0xbfd   :  { %v1778_v50 = vpop.f32.mrb[14].mxu0 }
 0xbfe   :  { %v1304_v51 = vadd.f32 %v1778_v50, %v2133_v22  ;;  %v1298_v13 = vpop.f32.mrb[15].mxu0 }
 0xbff   :  { %v1299_v15 = vadd.f32 %v1298_v13, %v2138_v23 }
 0xc00   :  { %v1710_v52 = vmul.f32 -1.442695, %v1304_v51 }
 0xc01   :  { %v1709_v55 = vmul.f32 -1.442695, %v1299_v15 }
 0xc02   :  { %1855 = vpow2.f32 %v1710_v52 }
 0xc03   :  { %1857 = vpow2.f32 %v1709_v55 }
 0xc0c   :  { %v1856_v19 = vpop.eup %1855 }
 0xc0d   :  { %v1858_v57 = vpop.eup %1857  ;;  %v1314_v21 = vadd.f32 1.0, %v1856_v19 }
 0xc0e   :  { %v1313_v58 = vadd.f32 1.0, %v1858_v57 }
 0xc10   :  { %1859 = vrcp.f32 %v1313_v58 }
 0xc11   :  { %1861 = vrcp.f32 %v1314_v21 }
 0xc1a   :  { %v1860_v39 = vpop.eup %1859 }
 0xc1b   :  { %1399 = vxpose.xlu1.b32.start [1/2] (short) (narrow) %v1860_v39, 8  ;;  %v1862_v48 = vpop.eup %1861  ;;  %v1327_v61 = vmul.f32 %v1860_v39, %v1322_v59 }
 0xc1f   :  { %1400 = vxpose.xlu1.b32.end [2/2] (short) (narrow) %v1862_v48, 8 }
 0xc3d   :  { %1323 = vrot.lane.b32.xlu1 %v2214_v56, %s1939_s1 }
 0xc3e   :  { %1823 = vset.pattern.permute.xlu1 %v1940_v9 }
 0xc9b   :  { %v1415_v22 = vpop.trf.xlu1 }
 0xc9c   :  { %v1434_v23 = vrot.slane %v1415_v22, %v2049_v20 }
 0xc9e   :  { %v1435_v44 = vmul.f32 %v1434_v23, %v2166_v42 }
 0xca0   :  { %1712 = vmatmul.mubr.msk.f32.vlgmr.msra.gmra.mrb[16].mxu0 %vm71_vm0, %v1435_v44 }
 0xcaf   :  { %v1324_v60 = vpop.permute.xlu1 %1323 }
 0xcb0   :  { %v1328_v62 = vmul.f32 %v1862_v48, %v1324_v60 }
 0xcb2   :  { %v1808_v63 = vpack.c.bf16 %v1328_v62, %v1327_v61 }
 0xcb4   :  { %1809 = vmatpush3.bf16.msra.mxu1 %v1808_v63 }
 0xcb7   :  { %1784 = vmatmul.mubr.msk.f32.vlgmr.msra.gmra.mrb[14].mxu1 %vm71_vm0, %v2187_v54 }
 0xcb8   :  { %1623 = vmatprep.mubr.f32.mxu1 %v1936_v0 }
 0xd73   :  { %v1505_v36 = vpop.f32.mrb[16].mxu0 }
 0xd74   :  { %v1507_v56 = vpop.f32.mrb[17].mxu0 }
 0xd75   :  { %v1510_v8 = vmax.f32 %v1505_v36, %v1507_v56 }
 0xd77   :  { %1511 = vmax.xlane.f32.xlu0 %v1510_v8 }
 0xd8a   :  { %v1395_v0 = vpop.f32.mrb[14].mxu1 }
 0xd8b   :  { %v1785_v54 = vpop.f32.mrb[15].mxu1 }
 0xe04   :  { %v1512_v42 = vpop.xlane.xlu0 %1511 }
 0xe05   :  { %v1513_v10 = vsub.f32 %v1505_v36, %v1512_v42  ;;  %v1514_v11 = vsub.f32 %v1507_v56, %v1512_v42 }
 0xe07   :  { %v1515_v12 = vmul.f32 1.442695, %v1513_v10  ;;  %v1517_v14 = vmul.f32 1.442695, %v1514_v11 }
 0xe09   :  { %1863 = vpow2.f32 %v1515_v12 }
 0xe0a   :  { %1865 = vpow2.f32 %v1517_v14 }
 0xe0b   :  { %1867 = vpow2.f32 %v1701_v24 }
 0xe0c   :  { %1869 = vpow2.f32 %v1702_v25 }
 0xe13   :  { %v1864_v16 = vpop.eup %1863 }
 0xe14   :  { %v1866_v17 = vpop.eup %1865 }
 0xe15   :  { %1559 = vmatprep.subr.mxu1 %v1866_v17  ;;  %v1519_v18 = vadd.f32 %v1866_v17, %v1864_v16  ;;  %v1868_v43 = vpop.eup %1867 }
 0xe16   :  { %1560 = vmatpush1.msra.mxu1 %v1864_v16  ;;  %v1870_v30 = vpop.eup %1869  ;;  %v846_v26 = vadd.f32 1.0, %v1868_v43 }
 0xe17   :  { %1520 = vadd.xlane.f32.xlu1 %v1519_v18  ;;  %v847_v4 = vadd.f32 1.0, %v1870_v30 }
 0xe18   :  { %1871 = vrcp.f32 %v846_v26 }
 0xe19   :  { %1873 = vrcp.f32 %v847_v4 }
 0xe28   :  { %854 = vperm.xlu1 %1823, %v2142_v34   ;;  %v1872_v34 = vpop.eup %1871 }
 0xe29   :  { %v869_v28 = vrot.slane %v1872_v34, %v2049_v20 }
 0xe2c   :  { %859 = vperm.xlu1 %1823, %v2145_v35   ;;  %v1874_v35 = vpop.eup %1873 }
 0xe2d   :  { %v873_v7 = vrot.slane %v1874_v35, %v2049_v20 }
 0xe30   :  { %1644 = vperm.xlu1 %1823, %v1860_v39  }
 0xe34   :  { %1649 = vperm.xlu1 %1823, %v1862_v48  }
 0xea4   :  { %v1521_v27 = vpop.xlane.xlu1 %1520 }
 0xea5   :  { %1875 = vrcp.f32 %v1521_v27 }
 0xea8   :  { %v855_v6 = vpop.permute.xlu1 %854 }
 0xea9   :  { %v862_v45 = vmul.f32 %v855_v6, %v2022_v3  ;;  %v863_v53 = vmul.f32 %v855_v6, %v2018_v1 }
 0xeab   :  { %v874_v29 = vmul.f32 %v869_v28, %v862_v45  ;;  %v875_v31 = vmul.f32 %v873_v7, %v863_v53 }
 0xeac   :  { %v860_v32 = vpop.permute.xlu1 %859 }
 0xead   :  { %878 = vst [vmem:[#allocation5] sm:$0xff] %v874_v29  ;;  %879 = vst [vmem:[#allocation5 + $0x8] sm:$0xff] %v875_v31  ;;  %v864_v46 = vmul.f32 %v860_v32, %v2028_v5  ;;  %v865_v47 = vmul.f32 %v860_v32, %v2020_v2 }
 0xeaf   :  { %v1876_v49 = vpop.eup %1875  ;;  %v876_v33 = vmul.f32 %v869_v28, %v864_v46  ;;  %v877_v50 = vmul.f32 %v873_v7, %v865_v47 }
 0xeb0   :  { %v1523_v51 = vmul.f32 %v1876_v49, %v1395_v0  ;;  %v1645_v57 = vpop.permute.xlu1 %1644 }
 0xeb1   :  { %880 = vst [vmem:[#allocation5 + $0x10] sm:$0xff] %v876_v33  ;;  %881 = vst [vmem:[#allocation5 + $0x18] sm:$0xff] %v877_v50  ;;  %v1652_v48 = vmul.f32 %v1645_v57, %v2159_v40  ;;  %v1653_v44 = vmul.f32 %v1645_v57, %v2148_v37 }
 0xeb2   :  { %1524 = vxpose.xlu0.b32.start.end [1/1] (short) (narrow) %v1523_v51, 8 }
 0xeb4   :  { %v1650_v58 = vpop.permute.xlu1 %1649 }
 0xeb5   :  { %v1654_v22 = vmul.f32 %v1650_v58, %v2161_v41  ;;  %v1655_v59 = vmul.f32 %v1650_v58, %v2150_v38 }
 0xedb   :  { %1824 = vset.pattern.permute.xlu0 %v1940_v9 }
 0xf32   :  { %v1540_v1 = vpop.trf.xlu0 }
 0xf33   :  { %1713 = vmatmul.mubr.msk.f32.vlgmr.msra.gmra.mrb[16].mxu1 %vm328_vm4, %v1540_v1 }
0x1006   :  { %v1625_v3 = vpop.f32.mrb[16].mxu1 }
0x1007   :  { %v1714_v13 = vmul.f32 -1.442695, %v1625_v3  ;;  %v1627_v15 = vpop.f32.mrb[17].mxu1 }
0x1008   :  { %v1715_v52 = vmul.f32 -1.442695, %v1627_v15 }
0x1009   :  { %1877 = vpow2.f32 %v1714_v13 }
0x100a   :  { %1879 = vpow2.f32 %v1715_v52 }
0x1013   :  { %v1878_v5 = vpop.eup %1877 }
0x1014   :  { %v1880_v55 = vpop.eup %1879  ;;  %v1636_v2 = vadd.f32 1.0, %v1878_v5 }
0x1015   :  { %v1637_v19 = vadd.f32 1.0, %v1880_v55 }
0x1016   :  { %1881 = vrcp.f32 %v1636_v2 }
0x1017   :  { %1883 = vrcp.f32 %v1637_v19 }
0x1020   :  { %v1882_v21 = vpop.eup %1881 }
0x1021   :  { %v1884_v39 = vpop.eup %1883  ;;  %v1659_v23 = vrot.slane %v1882_v21, %v2049_v20 }
0x1022   :  { %v1663_v60 = vrot.slane %v1884_v39, %v2049_v20 }
0x1023   :  { %v1664_v61 = vmul.f32 %v1659_v23, %v1652_v48  ;;  %v1666_v62 = vmul.f32 %v1659_v23, %v1654_v22 }
0x1024   :  { %v1665_v63 = vmul.f32 %v1663_v60, %v1653_v44  ;;  %v1667_v36 = vmul.f32 %v1663_v60, %v1655_v59 }
0x1025   :  { %1669 = vst [vmem:[#allocation5 + $0x20] sm:$0xff] %v1664_v61  ;;  %1671 = vst [vmem:[#allocation5 + $0x30] sm:$0xff] %v1666_v62 }
0x1026   :  { %1670 = vst [vmem:[#allocation5 + $0x28] sm:$0xff] %v1665_v63  ;;  %1672 = vst [vmem:[#allocation5 + $0x38] sm:$0xff] %v1667_v36 }
0x1027   :  { %1918 = shalt.err (!%p1915_p12)
}
0x1028   :  { %s1919_s1 = scalar_lea.hbm %s2293_s11, 1024 }
0x1029   :  { %p1920_p13 = scmp.ne.s32.totalorder %s2293_s11, %s1919_s1  ;;  %p1923_p0 = scmp.lt.u32.totalorder %s1919_s1, %s2293_s11 }
0x102b   :  { %p1925_p1 = pnand %p1923_p0, %p1920_p13 }
0x102d   :  { %1928 = shalt.err (!%p1925_p1)
}
0x102e   :  { %1684 = dma.vmem_to_hbm [thread:$0]  %s1679_s29, 1024, %s2293_s11, [#allocation4], %s1934_s27, %s1934_s27, %s1935_s28  }
0x102f   :  { %1931 = dma.done.wait [#allocation4], 1024  }
0x1030   :  { %1932 = vsyncadd [#allocation4], 4294966272 }
0x1031   :  { %1688 = vsyncpa [#allocation3], 1 }
0x1032   :  { %1689 = vsyncpa [#allocation4], 1 }

</bundles_post_ra>
